<compile_context>
chip_gen: v5e
topology: v5e:2x2
jax: 0.10.0
libtpu: 0.0.40
codegen_flags: <defaults>
</compile_context>

<pallas_src>
import functools

import jax
import jax.numpy as jnp
from jax.experimental import pallas as pl
from jax.experimental.pallas import tpu as pltpu


def _make_divisible(v, divisor, min_value=None):
    if min_value is None:
        min_value = divisor
    new_v = max(min_value, int(v + divisor / 2) // divisor * divisor)
    if new_v < 0.9 * v:
        new_v += divisor
    return new_v


def _pick_tile(dim, candidates):
    """Largest candidate that evenly divides dim; else the full dim (always legal)."""
    for c in candidates:
        if dim % c == 0:
            return c
    return dim


# ---------------------------------------------------------------------------
# Stage 1: global average pool.  x2d (rows=B*C, cols=H*W) -> pooled (rows, 1)
# Grid = (row tiles [parallel], col tiles [arbitrary, reduction last]).
# ---------------------------------------------------------------------------
def _pool_kernel(x_ref, o_ref, acc_ref, *, inv_hw):
    j = pl.program_id(1)

    @pl.when(j == 0)
    def _():
        acc_ref[...] = jnp.zeros_like(acc_ref)

    acc_ref[...] += jnp.sum(x_ref[...].astype(jnp.float32), axis=1, keepdims=True)

    @pl.when(j == pl.num_programs(1) - 1)
    def _():
        o_ref[...] = acc_ref[...] * inv_hw


# ---------------------------------------------------------------------------
# Stage 2: squeeze-excite gate.  pooled (B, C) -> gate (B, C)
#   gate = h_sigmoid(relu(pooled @ W1 + b1) @ W2 + b2)
# Tiny tensors: a single VMEM block, everything fused in one kernel.
# ---------------------------------------------------------------------------
def _se_gate_kernel(p_ref, w1_ref, b1_ref, w2_ref, b2_ref, g_ref):
    p = p_ref[...].astype(jnp.float32)
    h = jnp.dot(p, w1_ref[...].astype(jnp.float32),
                preferred_element_type=jnp.float32) + b1_ref[...].astype(jnp.float32)
    h = jnp.maximum(h, 0.0)                                   # ReLU
    g = jnp.dot(h, w2_ref[...].astype(jnp.float32),
                preferred_element_type=jnp.float32) + b2_ref[...].astype(jnp.float32)
    g = jnp.clip(g + 3.0, 0.0, 6.0) * (1.0 / 6.0)             # h_sigmoid = relu6(x+3)/6
    g_ref[...] = g.astype(g_ref.dtype)


# ---------------------------------------------------------------------------
# Stage 3: apply gate.  out2d = x2d * gate (broadcast across the H*W lanes).
# Both grid axes are independent -> fully parallel.
# ---------------------------------------------------------------------------
def _scale_kernel(x_ref, g_ref, o_ref):
    o_ref[...] = x_ref[...] * g_ref[...].astype(x_ref.dtype)


def se_layer(x, w1, b1, w2, b2):
    """SELayer forward.  x: (B, C, H, W); w1: (C, C_mid); b1: (1, C_mid);
    w2: (C_mid, C); b2: (1, C).  Weights use (in, out) layout (= PyTorch W.T)."""
    b, c, h, w = x.shape
    rows, cols = b * c, h * w
    x2d = x.reshape(rows, cols)                       # lane-dense slab (last dim mult of 128)

    # Tile sizes: <= (256, 2048) f32 = 2 MiB per buffer so in+out double buffers
    # (4 live tiles) stay well under the v7x 32 MiB scoped VMEM limit.
    tr = _pick_tile(rows, (256, 128, 64, 32, 16, 8))
    tc = _pick_tile(cols, (2048, 1024, 512, 256, 128))
    grid = (rows // tr, cols // tc)

    # ---- Stage 1: pooled means (rows, 1) in f32 -------------------------------
    pooled = pl.pallas_call(
        functools.partial(_pool_kernel, inv_hw=1.0 / float(cols)),
        out_shape=jax.ShapeDtypeStruct((rows, 1), jnp.float32),
        grid_spec=pltpu.PrefetchScalarGridSpec(
            num_scalar_prefetch=0,
            grid=grid,
            in_specs=[pl.BlockSpec((tr, tc), lambda i, j: (i, j))],
            out_specs=pl.BlockSpec((tr, 1), lambda i, j: (i, 0)),
            scratch_shapes=[pltpu.VMEM((tr, 1), jnp.float32)],
        ),
        compiler_params=pltpu.CompilerParams(
            dimension_semantics=("parallel", "arbitrary")),
    )(x2d)

    # ---- Stage 2: FC1 -> ReLU -> FC2 -> h_sigmoid, fused in one tiny kernel ----
    c_mid = w1.shape[1]
    gate = pl.pallas_call(
        _se_gate_kernel,
        out_shape=jax.ShapeDtypeStruct((b, c), x.dtype),
        in_specs=[
            pl.BlockSpec((b, c), lambda: (0, 0)),
            pl.BlockSpec((c, c_mid), lambda: (0, 0)),
            pl.BlockSpec((1, c_mid), lambda: (0, 0)),
            pl.BlockSpec((c_mid, c), lambda: (0, 0)),
            pl.BlockSpec((1, c), lambda: (0, 0)),
        ],
        out_specs=pl.BlockSpec((b, c), lambda: (0, 0)),
    )(pooled.reshape(b, c), w1, b1, w2, b2)

    # ---- Stage 3: out = x * gate (channel-wise broadcast) ----------------------
    gate2d = gate.reshape(rows, 1)
    out2d = pl.pallas_call(
        _scale_kernel,
        out_shape=jax.ShapeDtypeStruct((rows, cols), x.dtype),
        grid_spec=pltpu.PrefetchScalarGridSpec(
            num_scalar_prefetch=0,
            grid=grid,
            in_specs=[
                pl.BlockSpec((tr, tc), lambda i, j: (i, j)),
                pl.BlockSpec((tr, 1), lambda i, j: (i, 0)),
            ],
            out_specs=pl.BlockSpec((tr, tc), lambda i, j: (i, j)),
        ),
        compiler_params=pltpu.CompilerParams(
            dimension_semantics=("parallel", "parallel")),
    )(x2d, gate2d)

    return out2d.reshape(b, c, h, w)


# ---------------------------------------------------------------------------
# Pure-JAX reference (matches the PyTorch SELayer forward).
# ---------------------------------------------------------------------------
def se_layer_ref(x, w1, b1, w2, b2):
    y = jnp.mean(x.astype(jnp.float32), axis=(2, 3))                     # (B, C)
    y = jnp.maximum(y @ w1.astype(jnp.float32) + b1.astype(jnp.float32), 0.0)
    y = y @ w2.astype(jnp.float32) + b2.astype(jnp.float32)
    y = jnp.clip(y + 3.0, 0.0, 6.0) / 6.0                                # h_sigmoid
    out = x.astype(jnp.float32) * y[:, :, None, None]
    return out.astype(x.dtype)


if __name__ == "__main__":
    key = jax.random.PRNGKey(0)
    kx, k1, k2, k3, k4 = jax.random.split(key, 5)

    B, C, H, W = 2, 4, 16, 16
    C_mid = _make_divisible(C // 4, 8)   # = 8, as in the PyTorch module

    x = jax.random.normal(kx, (B, C, H, W), dtype=jnp.float32) * 2.0
    w1 = jax.random.normal(k1, (C, C_mid), dtype=jnp.float32) * 0.5
    b1 = jax.random.normal(k2, (1, C_mid), dtype=jnp.float32) * 0.1
    w2 = jax.random.normal(k3, (C_mid, C), dtype=jnp.float32) * 0.5
    b2 = jax.random.normal(k4, (1, C), dtype=jnp.float32) * 0.1

    y = se_layer(x, w1, b1, w2, b2)
    y = jax.block_until_ready(y)

    y_ref = se_layer_ref(x, w1, b1, w2, b2)
    assert y.shape == x.shape and y.dtype == x.dtype
    assert jnp.allclose(y, y_ref, atol=1e-5, rtol=1e-5), float(jnp.max(jnp.abs(y - y_ref)))

    print("KERNEL_OK")
</pallas_src>

<mosaic_0001>
module attributes {stable_mosaic.version = 11 : i64} {
  func.func @_pool_kernel(%arg0: i32, %arg1: i32, %arg2: memref<8x256xf32, #tpu.memory_space<vmem>>, %arg3: memref<8x1xf32, #tpu.memory_space<vmem>>, %arg4: memref<8x1xf32, #tpu.memory_space<vmem>>) attributes {dimension_semantics = [#tpu.dimension_semantics<parallel>, #tpu.dimension_semantics<arbitrary>], iteration_bounds = array<i64: 1, 1>, scalar_prefetch = 0 : i64, scratch_operands = 1 : i64, tpu.core_type = #tpu.core_type<tc>, window_params = [{transform_indices = @transform_0, window_bounds = array<i64: 8, 256>}, {transform_indices = @transform_1, window_bounds = array<i64: 8, 1>}]} {
    %c0_i32 = arith.constant 0 : i32
    %0 = arith.cmpi eq, %arg1, %c0_i32 : i32
    %1 = arith.extui %0 : i1 to i32
    %c0_i32_0 = arith.constant 0 : i32
    %2 = arith.cmpi ne, %1, %c0_i32_0 : i32
    scf.if %2 {
      %cst_8 = arith.constant 0.000000e+00 : f32
      %12 = vector.broadcast %cst_8 : f32 to vector<8x1xf32>
      %c0_9 = arith.constant 0 : index
      %c0_10 = arith.constant 0 : index
      %13 = vector.load %arg4[%c0_9, %c0_10] : memref<8x1xf32, #tpu.memory_space<vmem>>, vector<8x1xf32>
      tpu.vector_store %arg4[%c0_9, %c0_10], %12 {strides = array<i32>} : memref<8x1xf32, #tpu.memory_space<vmem>>, vector<8x1xf32>,
    } else {
    }
    %c0 = arith.constant 0 : index
    %c0_1 = arith.constant 0 : index
    %3 = vector.load %arg4[%c0, %c0_1] : memref<8x1xf32, #tpu.memory_space<vmem>>, vector<8x1xf32>
    %c0_2 = arith.constant 0 : index
    %c0_3 = arith.constant 0 : index
    %4 = vector.load %arg2[%c0_2, %c0_3] : memref<8x256xf32, #tpu.memory_space<vmem>>, vector<8x256xf32>
    %cst = arith.constant dense<0.000000e+00> : vector<8xf32>
    %5 = vector.multi_reduction <add>, %4, %cst [1] : vector<8x256xf32> to vector<8xf32>
    %6 = vector.shape_cast %5 : vector<8xf32> to vector<8x1xf32>
    %7 = arith.addf %3, %6 : vector<8x1xf32>
    %c0_4 = arith.constant 0 : index
    %c0_5 = arith.constant 0 : index
    %8 = vector.load %arg4[%c0_4, %c0_5] : memref<8x1xf32, #tpu.memory_space<vmem>>, vector<8x1xf32>
    tpu.vector_store %arg4[%c0_4, %c0_5], %7 {strides = array<i32>} : memref<8x1xf32, #tpu.memory_space<vmem>>, vector<8x1xf32>,
    %c0_i32_6 = arith.constant 0 : i32
    %9 = arith.cmpi eq, %arg1, %c0_i32_6 : i32
    %10 = arith.extui %9 : i1 to i32
    %c0_i32_7 = arith.constant 0 : i32
    %11 = arith.cmpi ne, %10, %c0_i32_7 : i32
    scf.if %11 {
      %c0_8 = arith.constant 0 : index
      %c0_9 = arith.constant 0 : index
      %12 = vector.load %arg4[%c0_8, %c0_9] : memref<8x1xf32, #tpu.memory_space<vmem>>, vector<8x1xf32>
      %cst_10 = arith.constant 3.906250e-03 : f32
      %13 = vector.broadcast %cst_10 : f32 to vector<8x1xf32>
      %14 = arith.mulf %12, %13 : vector<8x1xf32>
      %c0_11 = arith.constant 0 : index
      %c0_12 = arith.constant 0 : index
      %15 = vector.load %arg3[%c0_11, %c0_12] : memref<8x1xf32, #tpu.memory_space<vmem>>, vector<8x1xf32>
      tpu.vector_store %arg3[%c0_11, %c0_12], %14 {strides = array<i32>} : memref<8x1xf32, #tpu.memory_space<vmem>>, vector<8x1xf32>,
    } else {
    }
    return
  }
  func.func @transform_0(%arg0: i32, %arg1: i32) -> (i32, i32) {
    %c0_i32 = arith.constant 0 : i32
    return %arg0, %arg1 : i32, i32
  }
  func.func @transform_1(%arg0: i32, %arg1: i32) -> (i32, i32) {
    %c0_i32 = arith.constant 0 : i32
    %c0_i32_0 = arith.constant 0 : i32
    return %arg0, %c0_i32 : i32, i32
  }
}

</mosaic_0001>

<bundles_post_ra>
// kernel: tpu_custom_call.1
= control target key start
LH: loop header
LB: loop body
LE: loop exit
PB: predicated region body
PF: predicated region fallthrough
CT: control target
= control target key end

     0   :  { %6 = vsyncpa [#allocation4], 0  ;;  %s76_s9 = smov [#allocation3]   ;;  %s94_s0 = inlined_call_operand.hbm [shape: f32[8,256], index: 0, kind: input, shape index: {}]   ;;  %s95_s1 = inlined_call_operand.vmem [shape: f32[8,1], index: 1, kind: output, shape index: {}]  }
   0x1   :  { %s12_s8 = sshll.u32 %s94_s0, 4  ;;  %s14_s10 = sshll.u32 %s76_s9, 4  ;;  %s13_s8 = int_to_ptr.hbm [resolvable:$true] %s12_s8  ;;  %s15_s10 = int_to_ptr.vmem [resolvable:$true] %s14_s10 }
   0x2   :  { %17 = dma.hbm_to_vmem [thread:$0]  %s13_s8, 256, %s15_s10, [#allocation4]  }
   0x3   :  { %74 = dma.done.wait [#allocation4], 256  }
   0x4   :  { %75 = vsyncadd [#allocation4], 4294967040  ;;  %vm26_vm0 = vcmask 7168   ;;  %v77_v0 = vmov 0.0   ;;  %v29_v1 = vld [vmem:[#allocation3] sm:$0xff]  ;;  %v30_v2 = vld [vmem:[#allocation3 + $0x8] sm:$0xff] }
   0x5   :  { %27 = vst.msk [vmem:[#allocation2] sm:$0xff] %vm26_vm0, %v77_v0  ;;  %v31_v3 = vadd.f32 %v30_v2, %v29_v1 }
   0x7   :  { %32 = vadd.xlane.f32.xlu0 %v31_v3 }
   0xc   :  { %v28_v4 = vld [vmem:[#allocation2] sm:$0xff] }
  0x7a   :  { %v33_v5 = vpop.xlane.xlu0 %32 }
  0x7b   :  { %v34_v6 = vadd.f32 %v33_v5, %v28_v4 }
  0x7d   :  { %36 = vst.msk [vmem:[#allocation2] sm:$0xff] %vm26_vm0, %v34_v6 }
  0x84   :  { %v40_v7 = vld [vmem:[#allocation2] sm:$0xff] }
  0x85   :  { %v41_v8 = vmul.f32 0.00390625, %v40_v7 }
  0x87   :  { %42 = vst.msk [vmem:[%s95_s1] sm:$0xff] %vm26_vm0, %v41_v8 }
  0x88   :  { %47 = vsyncpa [#allocation4], 1 }

</bundles_post_ra>
